<compile_context>
chip_gen: v5e
topology: v5e:2x2
jax: 0.10.0
libtpu: 0.0.40
codegen_flags: <defaults>
</compile_context>

<pallas_src>
import jax
import jax.numpy as jnp
from jax import lax
from jax.experimental import pallas as pl
from jax.experimental.pallas import tpu as pltpu


def _round_up(x: int, m: int) -> int:
    return (x + m - 1) // m * m


def _make_kernel(threshold: int, base_vocab: int, vocab_tile: int):
    def kernel(tok_ref, tab_ref, out_ref, acc_ref):
        k = pl.program_id(1)

        @pl.when(k == 0)
        def _init():
            acc_ref[...] = jnp.zeros_like(acc_ref)

        tok = tok_ref[...]                                   # (TT, 1) int32
        tt = tok.shape[0]

        # Route: base tokens keep their index; ext tokens map into
        # [base_vocab, base_vocab + ext_vocab) of the fused table.
        idx = jnp.where(tok < threshold, tok, tok - threshold + base_vocab)

        # One-hot over this vocab tile (global row = local row + k*vocab_tile).
        rows = lax.broadcasted_iota(jnp.int32, (tt, vocab_tile), 1) + k * vocab_tile
        onehot = (rows == idx).astype(tab_ref.dtype)         # bf16, exact 0/1

        acc_ref[...] += jnp.dot(onehot, tab_ref[...],
                                preferred_element_type=jnp.float32)

        @pl.when(k == pl.num_programs(1) - 1)
        def _finalize():
            out_ref[...] = acc_ref[...].astype(out_ref.dtype)

    return kernel


def extended_embedding(input_tokens, base_weight, ext_weight, threshold, *,
                       token_tile: int = 256, vocab_tile: int = 512,
                       table_dtype=jnp.bfloat16):
    """input_tokens: [B, S] int32; returns [B, S, H] float32."""
    b, s = input_tokens.shape
    n = b * s
    vb, h = base_weight.shape
    ve, he = ext_weight.shape
    assert he == h, "base/ext hidden size mismatch"

    # Fuse the two tables once (base rows first, then ext rows); bf16 halves
    # the HBM/VMEM footprint and doubles MXU rate, and one-hot selection is
    # exact so outputs equal the bf16-rounded rows after f32 accumulation.
    table = jnp.concatenate(
        [base_weight.astype(table_dtype), ext_weight.astype(table_dtype)], axis=0)
    v_tot = vb + ve

    # Lane-dense hidden (multiple of 128) and MXU-friendly vocab tiling.
    h_pad = _round_up(h, 128)
    v_pad = _round_up(v_tot, vocab_tile)
    table = jnp.pad(table, ((0, v_pad - v_tot), (0, h_pad - h)))

    # Pad token count to a multiple of token_tile; padded slots look up base
    # row 0 and are sliced off below.
    n_pad = _round_up(n, token_tile)
    tok = input_tokens.reshape(n).astype(jnp.int32)
    tok = jnp.pad(tok, (0, n_pad - n)).reshape(n_pad, 1)

    n_tiles = n_pad // token_tile
    v_tiles = v_pad // vocab_tile

    # Per-step VMEM footprint estimate: double-buffered table / output / token
    # blocks, the f32 accumulator, one-hot + iota intermediates, plus headroom.
    est = (2 * vocab_tile * h_pad * table.dtype.itemsize   # table (double-buffered)
           + 2 * token_tile * h_pad * 4                    # out tile (double-buffered)
           + token_tile * h_pad * 4                        # accumulator scratch
           + 2 * token_tile * 4                            # token ids
           + token_tile * vocab_tile * 12                  # iota/compare/one-hot
           + (4 << 20))                                    # headroom
    vmem_limit = int(min(max(est, 32 << 20), 128 << 20))

    out_flat = pl.pallas_call(
        _make_kernel(int(threshold), vb, vocab_tile),
        out_shape=jax.ShapeDtypeStruct((n_pad, h_pad), jnp.float32),
        grid_spec=pltpu.PrefetchScalarGridSpec(
            num_scalar_prefetch=0,
            grid=(n_tiles, v_tiles),
            in_specs=[
                pl.BlockSpec((token_tile, 1), lambda i, k: (i, 0)),
                pl.BlockSpec((vocab_tile, h_pad), lambda i, k: (k, 0)),
            ],
            out_specs=pl.BlockSpec((token_tile, h_pad), lambda i, k: (i, 0)),
            scratch_shapes=[pltpu.VMEM((token_tile, h_pad), jnp.float32)],
        ),
        compiler_params=pltpu.CompilerParams(
            dimension_semantics=("parallel", "arbitrary"),
            vmem_limit_bytes=vmem_limit),
    )(tok, table)

    return out_flat[:n, :h].reshape(b, s, h)


if __name__ == "__main__":
    # Small, deterministic configuration consistent with the module:
    #   base vocab = 64, ext vocab = 16, hidden = 32, threshold = 64
    #   input tokens: [B=2, S=8], values in [0, 64+16)
    base_vocab = 64
    ext_vocab = 16
    hidden = 32
    threshold = base_vocab  # tokens >= threshold route to the ext table

    key = jax.random.PRNGKey(0)
    k_base, k_ext, k_tok = jax.random.split(key, 3)

    base_weight = jax.random.normal(k_base, (base_vocab, hidden), jnp.float32)
    ext_weight = jax.random.normal(k_ext, (ext_vocab, hidden), jnp.float32)

    input_tokens = jax.random.randint(
        k_tok, (2, 8), 0, base_vocab + ext_vocab, dtype=jnp.int32)

    out = extended_embedding(input_tokens, base_weight, ext_weight, threshold)
    out = jax.block_until_ready(out)

    # Pure-JAX reference with the same bf16 table rounding the kernel uses
    # (one-hot selection + f32 accumulation reproduces the bf16 rows exactly).
    base_bf = base_weight.astype(jnp.bfloat16).astype(jnp.float32)
    ext_bf = ext_weight.astype(jnp.bfloat16).astype(jnp.float32)
    is_ext = input_tokens >= threshold
    base_rows = base_bf[jnp.where(is_ext, 0, input_tokens)]
    ext_rows = ext_bf[jnp.where(is_ext, input_tokens - threshold, 0)]
    ref = jnp.where(is_ext[..., None], ext_rows, base_rows)

    # Full-precision reference (PyTorch forward semantics) for a loose check.
    base_rows_f = base_weight[jnp.where(is_ext, 0, input_tokens)]
    ext_rows_f = ext_weight[jnp.where(is_ext, input_tokens - threshold, 0)]
    ref_f32 = jnp.where(is_ext[..., None], ext_rows_f, base_rows_f)

    assert out.shape == (2, 8, hidden) and out.dtype == jnp.float32
    assert jnp.allclose(out, ref, atol=1e-6), "mismatch vs bf16 reference"
    assert jnp.allclose(out, ref_f32, rtol=2e-2, atol=5e-2), \
        "mismatch vs f32 reference"

    print("KERNEL_OK")
</pallas_src>

<mosaic_0001>
module attributes {stable_mosaic.version = 11 : i64} {
  func.func @kernel(%arg0: i32, %arg1: i32, %arg2: memref<256x1xi32, #tpu.memory_space<vmem>>, %arg3: memref<512x128xbf16, #tpu.memory_space<vmem>>, %arg4: memref<256x128xf32, #tpu.memory_space<vmem>>, %arg5: memref<256x128xf32, #tpu.memory_space<vmem>>) attributes {dimension_semantics = [#tpu.dimension_semantics<parallel>, #tpu.dimension_semantics<arbitrary>], iteration_bounds = array<i64: 1, 1>, scalar_prefetch = 0 : i64, scratch_operands = 1 : i64, tpu.core_type = #tpu.core_type<tc>, window_params = [{transform_indices = @transform_0, window_bounds = array<i64: 256, 1>}, {transform_indices = @transform_1, window_bounds = array<i64: 512, 128>}, {transform_indices = @transform_2, window_bounds = array<i64: 256, 128>}]} {
    %c0_i32 = arith.constant 0 : i32
    %0 = arith.cmpi eq, %arg1, %c0_i32 : i32
    %1 = arith.extui %0 : i1 to i32
    %c0_i32_0 = arith.constant 0 : i32
    %2 = arith.cmpi ne, %1, %c0_i32_0 : i32
    scf.if %2 {
      %cst_12 = arith.constant 0.000000e+00 : f32
      %28 = vector.broadcast %cst_12 : f32 to vector<256x128xf32>
      %c0_13 = arith.constant 0 : index
      %c0_14 = arith.constant 0 : index
      %29 = vector.load %arg5[%c0_13, %c0_14] : memref<256x128xf32, #tpu.memory_space<vmem>>, vector<256x128xf32>
      tpu.vector_store %arg5[%c0_13, %c0_14], %28 {strides = array<i32>} : memref<256x128xf32, #tpu.memory_space<vmem>>, vector<256x128xf32>,
    } else {
    }
    %c0 = arith.constant 0 : index
    %c0_1 = arith.constant 0 : index
    %3 = vector.load %arg2[%c0, %c0_1] : memref<256x1xi32, #tpu.memory_space<vmem>>, vector<256x1xi32>
    %c64_i32 = arith.constant 64 : i32
    %4 = vector.broadcast %c64_i32 : i32 to vector<256x1xi32>
    %5 = arith.cmpi slt, %3, %4 : vector<256x1xi32>
    %c64_i32_2 = arith.constant 64 : i32
    %6 = vector.broadcast %c64_i32_2 : i32 to vector<256x1xi32>
    %7 = arith.subi %3, %6 : vector<256x1xi32>
    %c64_i32_3 = arith.constant 64 : i32
    %8 = vector.broadcast %c64_i32_3 : i32 to vector<256x1xi32>
    %9 = arith.addi %7, %8 : vector<256x1xi32>
    %10 = arith.select %5, %3, %9 : vector<256x1xi1>, vector<256x1xi32>
    %11 = tpu.iota {dimensions = array<i32: 1>} : vector<256x512xi32>
    %c512_i32 = arith.constant 512 : i32
    %12 = arith.muli %arg1, %c512_i32 : i32
    %13 = vector.broadcast %12 : i32 to vector<256x512xi32>
    %14 = arith.addi %11, %13 : vector<256x512xi32>
    %15 = vector.broadcast %10 : vector<256x1xi32> to vector<256x512xi32>
    %16 = arith.cmpi eq, %14, %15 : vector<256x512xi32>
    %17 = arith.extui %16 : vector<256x512xi1> to vector<256x512xi32>
    %18 = arith.sitofp %17 : vector<256x512xi32> to vector<256x512xf32>
    %19 = arith.truncf %18 : vector<256x512xf32> to vector<256x512xbf16>
    %c0_4 = arith.constant 0 : index
    %c0_5 = arith.constant 0 : index
    %20 = vector.load %arg5[%c0_4, %c0_5] : memref<256x128xf32, #tpu.memory_space<vmem>>, vector<256x128xf32>
    %c0_6 = arith.constant 0 : index
    %c0_7 = arith.constant 0 : index
    %21 = vector.load %arg3[%c0_6, %c0_7] : memref<512x128xbf16, #tpu.memory_space<vmem>>, vector<512x128xbf16>
    %cst = arith.constant dense<0.000000e+00> : vector<256x128xf32>
    %22 = tpu.matmul %19, %21, %cst {dimension_numbers = #tpu.dot_dimension_numbers<[1], [0], [0], [1], [0, 0, 1, 1], [], []>} : vector<256x512xbf16>, vector<512x128xbf16>, vector<256x128xf32> -> vector<256x128xf32>
    %23 = arith.addf %20, %22 : vector<256x128xf32>
    %c0_8 = arith.constant 0 : index
    %c0_9 = arith.constant 0 : index
    %24 = vector.load %arg5[%c0_8, %c0_9] : memref<256x128xf32, #tpu.memory_space<vmem>>, vector<256x128xf32>
    tpu.vector_store %arg5[%c0_8, %c0_9], %23 {strides = array<i32>} : memref<256x128xf32, #tpu.memory_space<vmem>>, vector<256x128xf32>,
    %c0_i32_10 = arith.constant 0 : i32
    %25 = arith.cmpi eq, %arg1, %c0_i32_10 : i32
    %26 = arith.extui %25 : i1 to i32
    %c0_i32_11 = arith.constant 0 : i32
    %27 = arith.cmpi ne, %26, %c0_i32_11 : i32
    scf.if %27 {
      %c0_12 = arith.constant 0 : index
      %c0_13 = arith.constant 0 : index
      %28 = vector.load %arg5[%c0_12, %c0_13] : memref<256x128xf32, #tpu.memory_space<vmem>>, vector<256x128xf32>
      %c0_14 = arith.constant 0 : index
      %c0_15 = arith.constant 0 : index
      %29 = vector.load %arg4[%c0_14, %c0_15] : memref<256x128xf32, #tpu.memory_space<vmem>>, vector<256x128xf32>
      tpu.vector_store %arg4[%c0_14, %c0_15], %28 {strides = array<i32>} : memref<256x128xf32, #tpu.memory_space<vmem>>, vector<256x128xf32>,
    } else {
    }
    return
  }
  func.func @transform_0(%arg0: i32, %arg1: i32) -> (i32, i32) {
    %c0_i32 = arith.constant 0 : i32
    %c0_i32_0 = arith.constant 0 : i32
    return %arg0, %c0_i32 : i32, i32
  }
  func.func @transform_1(%arg0: i32, %arg1: i32) -> (i32, i32) {
    %c0_i32 = arith.constant 0 : i32
    %c0_i32_0 = arith.constant 0 : i32
    return %arg1, %c0_i32 : i32, i32
  }
  func.func @transform_2(%arg0: i32, %arg1: i32) -> (i32, i32) {
    %c0_i32 = arith.constant 0 : i32
    %c0_i32_0 = arith.constant 0 : i32
    return %arg0, %c0_i32 : i32, i32
  }
}

</mosaic_0001>

<bundles_post_ra>
// kernel: tpu_custom_call.1
= control target key start
LH: loop header
LB: loop body
LE: loop exit
PB: predicated region body
PF: predicated region fallthrough
CT: control target
= control target key end

     0   :  { %v1878_v3 = vmov 0   ;;  %s2296_s0 = inlined_call_operand.vmem [shape: s32[256,1], index: 0, kind: input, shape index: {}]   ;;  %s2297_s1 = inlined_call_operand.vmem [shape: bf16[512,128], index: 1, kind: input, shape index: {}]   ;;  %s2298_s2 = inlined_call_operand.hbm [shape: f32[256,128], index: 2, kind: output, shape index: {}]  }
   0x1   :  { %v52_v0 = vld [vmem:[%s2296_s0 + $0x20] sm:$0xff]  ;;  %v50_v1 = vld [vmem:[%s2296_s0 + $0x10] sm:$0xff]  ;;  %1851 = vset.pattern.permute.xlu2 %v1878_v3  ;;  %1850 = vset.pattern.permute.xlu1 %v1878_v3 }
   0x2   :  { %v48_v2 = vld [vmem:[%s2296_s0] sm:$0xff]  ;;  %1849 = vset.pattern.permute.xlu0 %v1878_v3  ;;  %104 = vperm.xlu2 %1851, %v52_v0  }
   0x3   :  { %98 = vperm.xlu1 %1850, %v50_v1   ;;  %92 = vperm.xlu0 %1849, %v48_v2  }
   0x4   :  { %7 = vsyncpa [#allocation4], 0  ;;  %v53_v4 = vld [vmem:[%s2296_s0 + $0x28] sm:$0xff]  ;;  %v51_v5 = vld [vmem:[%s2296_s0 + $0x18] sm:$0xff]  ;;  %v80_v1 = vlaneseq  ;;  %s1416_s27 = sshll.u32 %s2298_s2, 4  ;;  %s1881_s28 = smov 128   ;;  %s1417_s27 = int_to_ptr.hbm [resolvable:$true] %s1416_s27 }
   0x5   :  { %v49_v6 = vld [vmem:[%s2296_s0 + $0x8] sm:$0xff]  ;;  %v56_v7 = vld [vmem:[%s2296_s0 + $0x40] sm:$0xff]  ;;  %v55_v8 = vld [vmem:[%s2296_s0 + $0x38] sm:$0xff]  ;;  %s1882_s29 = smov 8  }
   0x6   :  { %v54_v9 = vld [vmem:[%s2296_s0 + $0x30] sm:$0xff]  ;;  %v59_v10 = vld [vmem:[%s2296_s0 + $0x58] sm:$0xff]  ;;  %v57_v12 = vld [vmem:[%s2296_s0 + $0x48] sm:$0xff]  ;;  %v2090_v3 = vand.u32 127, %v80_v1 }
   0x7   :  { %v58_v11 = vld [vmem:[%s2296_s0 + $0x50] sm:$0xff]  ;;  %v61_v14 = vld [vmem:[%s2296_s0 + $0x68] sm:$0xff]  ;;  %v60_v15 = vld [vmem:[%s2296_s0 + $0x60] sm:$0xff] }
   0x8   :  { %v62_v13 = vld [vmem:[%s2296_s0 + $0x70] sm:$0xff]  ;;  %v65_v16 = vld [vmem:[%s2296_s0 + $0x88] sm:$0xff]  ;;  %v64_v17 = vld [vmem:[%s2296_s0 + $0x80] sm:$0xff] }
   0x9   :  { %v63_v18 = vld [vmem:[%s2296_s0 + $0x78] sm:$0xff]  ;;  %v68_v19 = vld [vmem:[%s2296_s0 + $0xa0] sm:$0xff]  ;;  %v66_v21 = vld [vmem:[%s2296_s0 + $0x90] sm:$0xff] }
   0xa   :  { %107 = vperm.xlu2 %1851, %v53_v4   ;;  %v67_v20 = vld [vmem:[%s2296_s0 + $0x98] sm:$0xff]  ;;  %v70_v23 = vld [vmem:[%s2296_s0 + $0xb0] sm:$0xff]  ;;  %v69_v24 = vld [vmem:[%s2296_s0 + $0xa8] sm:$0xff]  ;;  %v2093_v4 = vadd.s32 128, %v2090_v3 }
   0xb   :  { %101 = vperm.xlu1 %1850, %v51_v5   ;;  %95 = vperm.xlu0 %1849, %v49_v6   ;;  %v71_v22 = vld [vmem:[%s2296_s0 + $0xb8] sm:$0xff]  ;;  %v1818_v29 = vld [vmem:[%s2297_s1 + $0x30] sm:$0xff]  ;;  %v73_v31 = vld [vmem:[%s2296_s0 + $0xc8] sm:$0xff]  ;;  %v2096_v5 = vadd.s32 256, %v2090_v3 }
   0xc   :  { %v1819_v25 = vld [vmem:[%s2297_s1 + $0x38] sm:$0xff]  ;;  %v74_v30 = vld [vmem:[%s2296_s0 + $0xd0] sm:$0xff]  ;;  %v72_v32 = vld [vmem:[%s2296_s0 + $0xc0] sm:$0xff] }
   0xd   :  { %v1827_v26 = vld [vmem:[%s2297_s1 + $0x78] sm:$0xff]  ;;  %923 = vmatpush.bf16.msra.mxu0 %v1819_v25  ;;  %v1826_v33 = vld [vmem:[%s2297_s1 + $0x70] sm:$0xff]  ;;  %v1817_v36 = vld [vmem:[%s2297_s1 + $0x28] sm:$0xff] }
   0xe   :  { %v1835_v27 = vld [vmem:[%s2297_s1 + $0xb8] sm:$0xff]  ;;  %1012 = vmatpush.bf16.msra.mxu1 %v1827_v26  ;;  %v1834_v34 = vld [vmem:[%s2297_s1 + $0xb0] sm:$0xff]  ;;  %v1825_v37 = vld [vmem:[%s2297_s1 + $0x68] sm:$0xff] }
   0xf   :  { %v1843_v28 = vld [vmem:[%s2297_s1 + $0xf8] sm:$0xff]  ;;  %1101 = vmatpush.bf16.msra.mxu2 %v1835_v27  ;;  %v1842_v35 = vld [vmem:[%s2297_s1 + $0xf0] sm:$0xff]  ;;  %v1833_v38 = vld [vmem:[%s2297_s1 + $0xa8] sm:$0xff] }
  0x10   :  { %1190 = vmatpush.bf16.msra.mxu3 %v1843_v28  ;;  %v1841_v39 = vld [vmem:[%s2297_s1 + $0xe8] sm:$0xff]  ;;  %v1816_v40 = vld [vmem:[%s2297_s1 + $0x20] sm:$0xff]  ;;  %v75_v43 = vld [vmem:[%s2296_s0 + $0xd8] sm:$0xff] }
  0x11   :  { %924 = vmatpush.bf16.msra.mxu0 %v1818_v29  ;;  %v77_v41 = vld [vmem:[%s2296_s0 + $0xe8] sm:$0xff]  ;;  %v76_v42 = vld [vmem:[%s2296_s0 + $0xe0] sm:$0xff]  ;;  %v1815_v47 = vld [vmem:[%s2297_s1 + $0x18] sm:$0xff] }
  0x12   :  { %116 = vperm.xlu2 %1851, %v56_v7   ;;  %1013 = vmatpush.bf16.msra.mxu1 %v1826_v33  ;;  %v1824_v44 = vld [vmem:[%s2297_s1 + $0x60] sm:$0xff]  ;;  %v1823_v48 = vld [vmem:[%s2297_s1 + $0x58] sm:$0xff]  ;;  %v1814_v51 = vld [vmem:[%s2297_s1 + $0x10] sm:$0xff]  ;;  %v2099_v7 = vadd.s32 384, %v2090_v3 }
  0x13   :  { %113 = vperm.xlu1 %1850, %v55_v8   ;;  %110 = vperm.xlu0 %1849, %v54_v9   ;;  %v1832_v45 = vld [vmem:[%s2297_s1 + $0xa0] sm:$0xff]  ;;  %v1831_v49 = vld [vmem:[%s2297_s1 + $0x98] sm:$0xff]  ;;  %v78_v53 = vld [vmem:[%s2296_s0 + $0xf0] sm:$0xff]  ;;  %v1879_v8 = vmov 1.0|1.0  }
  0x14   :  { %1102 = vmatpush.bf16.msra.mxu2 %v1834_v34  ;;  %1191 = vmatpush.bf16.msra.mxu3 %v1842_v35  ;;  %v1840_v46 = vld [vmem:[%s2297_s1 + $0xe0] sm:$0xff]  ;;  %v1839_v50 = vld [vmem:[%s2297_s1 + $0xd8] sm:$0xff]  ;;  %v1822_v54 = vld [vmem:[%s2297_s1 + $0x50] sm:$0xff] }
  0x15   :  { %925 = vmatpush.bf16.msra.mxu0 %v1817_v36  ;;  %v79_v52 = vld [vmem:[%s2296_s0 + $0xf8] sm:$0xff]  ;;  %v1830_v55 = vld [vmem:[%s2297_s1 + $0x90] sm:$0xff]  ;;  %v1813_v57 = vld [vmem:[%s2297_s1 + $0x8] sm:$0xff] }
  0x16   :  { %1014 = vmatpush.bf16.msra.mxu1 %v1825_v37  ;;  %v1838_v56 = vld [vmem:[%s2297_s1 + $0xd0] sm:$0xff]  ;;  %v1821_v58 = vld [vmem:[%s2297_s1 + $0x48] sm:$0xff]  ;;  %v1812_v61 = vld [vmem:[%s2297_s1] sm:$0xff] }
  0x17   :  { %v1829_v59 = vld [vmem:[%s2297_s1 + $0x88] sm:$0xff]  ;;  %v1820_v62 = vld [vmem:[%s2297_s1 + $0x40] sm:$0xff] }
  0x18   :  { %1103 = vmatpush.bf16.msra.mxu2 %v1833_v38  ;;  %1192 = vmatpush.bf16.msra.mxu3 %v1841_v39  ;;  %v1837_v60 = vld [vmem:[%s2297_s1 + $0xc8] sm:$0xff]  ;;  %v1828_v63 = vld [vmem:[%s2297_s1 + $0x80] sm:$0xff] }
  0x19   :  { %926 = vmatpush.bf16.msra.mxu0 %v1816_v40  ;;  %v1836_v0 = vld [vmem:[%s2297_s1 + $0xc0] sm:$0xff]  ;;  %s1880_s1 = smov [#allocation3]  }
  0x1a   :  { %125 = vperm.xlu2 %1851, %v59_v10   ;;  %1015 = vmatpush.bf16.msra.mxu1 %v1824_v44  ;;  %s1414_s24 = sshll.u32 %s1880_s1, 4  ;;  %s1415_s24 = int_to_ptr.vmem [resolvable:$true] %s1414_s24 }
  0x1b   :  { %122 = vperm.xlu1 %1850, %v58_v11   ;;  %119 = vperm.xlu0 %1849, %v57_v12  }
  0x1c   :  { %1104 = vmatpush.bf16.msra.mxu2 %v1832_v45  ;;  %1193 = vmatpush.bf16.msra.mxu3 %v1840_v46 }
  0x1d   :  { %927 = vmatpush.bf16.msra.mxu0 %v1815_v47 }
  0x1e   :  { %1016 = vmatpush.bf16.msra.mxu1 %v1823_v48 }
  0x20   :  { %1105 = vmatpush.bf16.msra.mxu2 %v1831_v49  ;;  %1194 = vmatpush.bf16.msra.mxu3 %v1839_v50 }
  0x21   :  { %928 = vmatpush.bf16.msra.mxu0 %v1814_v51 }
  0x22   :  { %134 = vperm.xlu2 %1851, %v62_v13   ;;  %1017 = vmatpush.bf16.msra.mxu1 %v1822_v54 }
  0x23   :  { %131 = vperm.xlu1 %1850, %v61_v14   ;;  %128 = vperm.xlu0 %1849, %v60_v15  }
  0x24   :  { %1106 = vmatpush.bf16.msra.mxu2 %v1830_v55  ;;  %1195 = vmatpush.bf16.msra.mxu3 %v1838_v56 }
  0x25   :  { %929 = vmatpush.bf16.msra.mxu0 %v1813_v57 }
  0x26   :  { %1018 = vmatpush.bf16.msra.mxu1 %v1821_v58 }
  0x28   :  { %1107 = vmatpush.bf16.msra.mxu2 %v1829_v59  ;;  %1196 = vmatpush.bf16.msra.mxu3 %v1837_v60 }
  0x29   :  { %930 = vmatpush.bf16.msra.mxu0 %v1812_v61 }
  0x2a   :  { %143 = vperm.xlu2 %1851, %v65_v16   ;;  %1019 = vmatpush.bf16.msra.mxu1 %v1820_v62 }
  0x2b   :  { %140 = vperm.xlu1 %1850, %v64_v17   ;;  %137 = vperm.xlu0 %1849, %v63_v18  }
  0x2c   :  { %1108 = vmatpush.bf16.msra.mxu2 %v1828_v63  ;;  %1197 = vmatpush.bf16.msra.mxu3 %v1836_v0 }
  0x32   :  { %152 = vperm.xlu2 %1851, %v68_v19  }
  0x33   :  { %149 = vperm.xlu1 %1850, %v67_v20   ;;  %146 = vperm.xlu0 %1849, %v66_v21  }
  0x3a   :  { %161 = vperm.xlu2 %1851, %v71_v22  }
  0x3b   :  { %158 = vperm.xlu1 %1850, %v70_v23   ;;  %155 = vperm.xlu0 %1849, %v69_v24  }
  0x42   :  { %170 = vperm.xlu2 %1851, %v74_v30  }
  0x43   :  { %167 = vperm.xlu1 %1850, %v73_v31   ;;  %164 = vperm.xlu0 %1849, %v72_v32  }
  0x4a   :  { %179 = vperm.xlu2 %1851, %v77_v41  }
  0x4b   :  { %176 = vperm.xlu1 %1850, %v76_v42   ;;  %173 = vperm.xlu0 %1849, %v75_v43  }
  0x53   :  { %185 = vperm.xlu1 %1850, %v79_v52   ;;  %182 = vperm.xlu0 %1849, %v78_v53  }
  0x5c   :  { %v105_v11 = vpop.permute.xlu2 %104 }
  0x64   :  { %v108_v12 = vpop.permute.xlu2 %107 }
  0x6c   :  { %v117_v16 = vpop.permute.xlu2 %116 }
  0x74   :  { %v126_v18 = vpop.permute.xlu2 %125 }
  0x75   :  { %v93_v2 = vpop.permute.xlu0 %92  ;;  %v99_v9 = vpop.permute.xlu1 %98 }
  0x76   :  { %vm187_vm0 = vcmp.eq.s32.totalorder %v2090_v3, %v93_v2  ;;  %vm188_vm5 = vcmp.eq.s32.totalorder %v2093_v4, %v93_v2  ;;  %vm189_vm8 = vcmp.eq.s32.totalorder %v2096_v5, %v93_v2  ;;  %vm190_vm10 = vcmp.eq.s32.totalorder %v2099_v7, %v93_v2 }
  0x77   :  { %vm195_vm12 = vcmp.eq.s32.totalorder %v2090_v3, %v99_v9  ;;  %vm196_vm14 = vcmp.eq.s32.totalorder %v2093_v4, %v99_v9 }
  0x7c   :  { %v135_v22 = vpop.permute.xlu2 %134 }
  0x7d   :  { %v96_v6 = vpop.permute.xlu0 %95  ;;  %v102_v10 = vpop.permute.xlu1 %101 }
  0x7e   :  { %vm191_vm1 = vcmp.eq.s32.totalorder %v2090_v3, %v96_v6  ;;  %vm192_vm2 = vcmp.eq.s32.totalorder %v2093_v4, %v96_v6  ;;  %vm193_vm3 = vcmp.eq.s32.totalorder %v2096_v5, %v96_v6  ;;  %vm194_vm6 = vcmp.eq.s32.totalorder %v2099_v7, %v96_v6 }
  0x7f   :  { %vm1684_vm4 = vmpackc.low %vm191_vm1, %vm187_vm0  ;;  %vm199_vm13 = vcmp.eq.s32.totalorder %v2090_v3, %v102_v10  ;;  %vm200_vm15 = vcmp.eq.s32.totalorder %v2093_v4, %v102_v10  ;;  %vm197_vm0 = vcmp.eq.s32.totalorder %v2096_v5, %v99_v9  ;;  %vm201_vm1 = vcmp.eq.s32.totalorder %v2096_v5, %v102_v10 }
  0x80   :  { %1685 = vmatmul.msk.bf16.vlgmr.msra.gmra.mxu0 %vm1684_vm4, %v1879_v8  ;;  %vm1716_vm7 = vmpackc.low %vm192_vm2, %vm188_vm5  ;;  %vm202_vm4 = vcmp.eq.s32.totalorder %v2099_v7, %v102_v10 }
  0x81   :  { %1717 = vmatmul.msk.bf16.vlgmr.msra.gmra.mxu1 %vm1716_vm7, %v1879_v8  ;;  %vm1748_vm9 = vmpackc.low %vm193_vm3, %vm189_vm8  ;;  %vm198_vm3 = vcmp.eq.s32.totalorder %v2099_v7, %v99_v9  ;;  %vm203_vm8 = vcmp.eq.s32.totalorder %v2090_v3, %v105_v11 }
  0x82   :  { %1749 = vmatmul.msk.bf16.vlgmr.msra.gmra.mxu2 %vm1748_vm9, %v1879_v8  ;;  %vm1780_vm11 = vmpackc.low %vm194_vm6, %vm190_vm10  ;;  %vm207_vm9 = vcmp.eq.s32.totalorder %v2090_v3, %v108_v12  ;;  %vm204_vm10 = vcmp.eq.s32.totalorder %v2093_v4, %v105_v11 }
  0x83   :  { %1781 = vmatmul.msk.bf16.vlgmr.msra.gmra.mxu3 %vm1780_vm11, %v1879_v8  ;;  %vm1686_vm2 = vmpackc.low %vm199_vm13, %vm195_vm12  ;;  %vm208_vm11 = vcmp.eq.s32.totalorder %v2093_v4, %v108_v12  ;;  %vm205_vm12 = vcmp.eq.s32.totalorder %v2096_v5, %v105_v11  ;;  %vm209_vm13 = vcmp.eq.s32.totalorder %v2096_v5, %v108_v12 }
  0x84   :  { %vm1718_vm5 = vmpackc.low %vm200_vm15, %vm196_vm14  ;;  %vm206_vm15 = vcmp.eq.s32.totalorder %v2099_v7, %v105_v11  ;;  %v144_v24 = vpop.permute.xlu2 %143 }
  0x85   :  { %vm1750_vm6 = vmpackc.low %vm201_vm1, %vm197_vm0  ;;  %vm210_vm0 = vcmp.eq.s32.totalorder %v2099_v7, %v108_v12  ;;  %v114_v13 = vpop.permute.xlu1 %113  ;;  %v111_v14 = vpop.permute.xlu0 %110 }
  0x86   :  { %vm1782_vm7 = vmpackc.low %vm202_vm4, %vm198_vm3  ;;  %vm211_vm4 = vcmp.eq.s32.totalorder %v2090_v3, %v111_v14 }
  0x87   :  { %vm1688_vm14 = vmpackc.low %vm207_vm9, %vm203_vm8  ;;  %vm213_vm8 = vcmp.eq.s32.totalorder %v2096_v5, %v111_v14  ;;  %vm217_vm9 = vcmp.eq.s32.totalorder %v2096_v5, %v114_v13 }
  0x88   :  { %vm1720_vm1 = vmpackc.low %vm208_vm11, %vm204_vm10  ;;  %vm214_vm11 = vcmp.eq.s32.totalorder %v2099_v7, %v111_v14 }
  0x89   :  { %vm1784_vm3 = vmpackc.low %vm210_vm0, %vm206_vm15  ;;  %vm219_vm0 = vcmp.eq.s32.totalorder %v2090_v3, %v117_v16 }
  0x8c   :  { %v153_v51 = vpop.permute.xlu2 %152 }
  0x8d   :  { %v120_v15 = vpop.permute.xlu0 %119  ;;  %v123_v17 = vpop.permute.xlu1 %122 }
  0x90   :  { %1687 = vmatmul.msk.bf16.gmra.mxu0 %vm1686_vm2, %v1879_v8  ;;  %vm1752_vm2 = vmpackc.low %vm209_vm13, %vm205_vm12  ;;  %vm218_vm12 = vcmp.eq.s32.totalorder %v2099_v7, %v114_v13 }
  0x91   :  { %1719 = vmatmul.msk.bf16.gmra.mxu1 %vm1718_vm5, %v1879_v8  ;;  %vm215_vm5 = vcmp.eq.s32.totalorder %v2090_v3, %v114_v13  ;;  %vm1786_vm15 = vmpackc.low %vm218_vm12, %vm214_vm11  ;;  %vm227_vm12 = vcmp.eq.s32.totalorder %v2090_v3, %v123_v17 }
  0x92   :  { %1751 = vmatmul.msk.bf16.gmra.mxu2 %vm1750_vm6, %v1879_v8  ;;  %vm212_vm6 = vcmp.eq.s32.totalorder %v2093_v4, %v111_v14  ;;  %vm1690_vm10 = vmpackc.low %vm215_vm5, %vm211_vm4  ;;  %vm221_vm4 = vcmp.eq.s32.totalorder %v2096_v5, %v117_v16  ;;  %vm225_vm5 = vcmp.eq.s32.totalorder %v2096_v5, %v120_v15 }
  0x93   :  { %1783 = vmatmul.msk.bf16.gmra.mxu3 %vm1782_vm7, %v1879_v8  ;;  %vm216_vm7 = vcmp.eq.s32.totalorder %v2093_v4, %v114_v13 }
  0x94   :  { %vm1722_vm13 = vmpackc.low %vm216_vm7, %vm212_vm6  ;;  %vm222_vm7 = vcmp.eq.s32.totalorder %v2099_v7, %v117_v16  ;;  %v162_v6 = vpop.permute.xlu2 %161 }
  0x95   :  { %v132_v19 = vpop.permute.xlu1 %131  ;;  %v129_v20 = vpop.permute.xlu0 %128 }
  0x9d   :  { %v138_v21 = vpop.permute.xlu0 %137  ;;  %v141_v23 = vpop.permute.xlu1 %140 }
  0xa0   :  { %1689 = vmatmul.msk.bf16.gmra.mxu0 %vm1688_vm14, %v1879_v8  ;;  %vm1754_vm14 = vmpackc.low %vm217_vm9, %vm213_vm8  ;;  %vm226_vm8 = vcmp.eq.s32.totalorder %v2099_v7, %v120_v15 }
  0xa1   :  { %1721 = vmatmul.msk.bf16.gmra.mxu1 %vm1720_vm1, %v1879_v8  ;;  %vm223_vm1 = vcmp.eq.s32.totalorder %v2090_v3, %v120_v15  ;;  %vm1788_vm11 = vmpackc.low %vm226_vm8, %vm222_vm7  ;;  %vm235_vm8 = vcmp.eq.s32.totalorder %v2090_v3, %v129_v20 }
  0xa2   :  { %1753 = vmatmul.msk.bf16.gmra.mxu2 %vm1752_vm2, %v1879_v8  ;;  %vm220_vm2 = vcmp.eq.s32.totalorder %v2093_v4, %v117_v16  ;;  %vm1692_vm6 = vmpackc.low %vm223_vm1, %vm219_vm0  ;;  %vm229_vm0 = vcmp.eq.s32.totalorder %v2096_v5, %v123_v17  ;;  %vm233_vm1 = vcmp.eq.s32.totalorder %v2096_v5, %v126_v18 }
  0xa3   :  { %1785 = vmatmul.msk.bf16.gmra.mxu3 %vm1784_vm3, %v1879_v8  ;;  %vm224_vm3 = vcmp.eq.s32.totalorder %v2093_v4, %v120_v15 }
  0xa4   :  { %vm1724_vm9 = vmpackc.low %vm224_vm3, %vm220_vm2  ;;  %vm230_vm3 = vcmp.eq.s32.totalorder %v2099_v7, %v123_v17 }
  0xa5   :  { %v150_v34 = vpop.permute.xlu1 %149  ;;  %v147_v35 = vpop.permute.xlu0 %146 }
  0xad   :  { %v156_v50 = vpop.permute.xlu0 %155  ;;  %v159_v2 = vpop.permute.xlu1 %158 }
  0xb0   :  { %1691 = vmatmul.msk.bf16.gmra.mxu0 %vm1690_vm10, %v1879_v8  ;;  %vm1756_vm10 = vmpackc.low %vm225_vm5, %vm221_vm4  ;;  %vm234_vm4 = vcmp.eq.s32.totalorder %v2099_v7, %v126_v18 }
  0xb1   :  { %1723 = vmatmul.msk.bf16.gmra.mxu1 %vm1722_vm13, %v1879_v8  ;;  %vm231_vm13 = vcmp.eq.s32.totalorder %v2090_v3, %v126_v18  ;;  %vm1790_vm7 = vmpackc.low %vm234_vm4, %vm230_vm3  ;;  %vm247_vm4 = vcmp.eq.s32.totalorder %v2090_v3, %v138_v21 }
  0xb2   :  { %1755 = vmatmul.msk.bf16.gmra.mxu2 %vm1754_vm14, %v1879_v8  ;;  %vm228_vm14 = vcmp.eq.s32.totalorder %v2093_v4, %v123_v17  ;;  %vm1694_vm2 = vmpackc.low %vm231_vm13, %vm227_vm12  ;;  %vm237_vm12 = vcmp.eq.s32.totalorder %v2096_v5, %v129_v20  ;;  %vm241_vm13 = vcmp.eq.s32.totalorder %v2096_v5, %v132_v19 }
  0xb3   :  { %1787 = vmatmul.msk.bf16.gmra.mxu3 %vm1786_vm15, %v1879_v8  ;;  %vm232_vm15 = vcmp.eq.s32.totalorder %v2093_v4, %v126_v18 }
  0xb4   :  { %vm1726_vm5 = vmpackc.low %vm232_vm15, %vm228_vm14  ;;  %vm238_vm15 = vcmp.eq.s32.totalorder %v2099_v7, %v129_v20 }
  0xc0   :  { %1693 = vmatmul.msk.bf16.gmra.mxu0 %vm1692_vm6, %v1879_v8  ;;  %vm1758_vm6 = vmpackc.low %vm233_vm1, %vm229_vm0  ;;  %vm242_vm0 = vcmp.eq.s32.totalorder %v2099_v7, %v132_v19 }
  0xc1   :  { %1725 = vmatmul.msk.bf16.gmra.mxu1 %vm1724_vm9, %v1879_v8  ;;  %vm239_vm9 = vcmp.eq.s32.totalorder %v2090_v3, %v132_v19  ;;  %vm1792_vm3 = vmpackc.low %vm242_vm0, %vm238_vm15  ;;  %vm251_vm0 = vcmp.eq.s32.totalorder %v2090_v3, %v141_v23 }
  0xc2   :  { %1757 = vmatmul.msk.bf16.gmra.mxu2 %vm1756_vm10, %v1879_v8  ;;  %vm236_vm10 = vcmp.eq.s32.totalorder %v2093_v4, %v129_v20  ;;  %vm1696_vm14 = vmpackc.low %vm239_vm9, %vm235_vm8  ;;  %vm244_vm9 = vcmp.eq.s32.totalorder %v2093_v4, %v135_v22 }
  0xc3   :  { %1789 = vmatmul.msk.bf16.gmra.mxu3 %vm1788_vm11, %v1879_v8  ;;  %vm240_vm11 = vcmp.eq.s32.totalorder %v2093_v4, %v132_v19 }
  0xc4   :  { %vm1728_vm1 = vmpackc.low %vm240_vm11, %vm236_vm10  ;;  %vm250_vm10 = vcmp.eq.s32.totalorder %v2099_v7, %v138_v21 }
  0xd0   :  { %1695 = vmatmul.msk.bf16.gmra.mxu0 %vm1694_vm2, %v1879_v8  ;;  %vm1760_vm2 = vmpackc.low %vm241_vm13, %vm237_vm12  ;;  %vm245_vm12 = vcmp.eq.s32.totalorder %v2096_v5, %v135_v22 }
  0xd1   :  { %1727 = vmatmul.msk.bf16.gmra.mxu1 %vm1726_vm5, %v1879_v8  ;;  %vm248_vm5 = vcmp.eq.s32.totalorder %v2093_v4, %v138_v21 }
  0xd2   :  { %1759 = vmatmul.msk.bf16.gmra.mxu2 %vm1758_vm6, %v1879_v8  ;;  %vm243_vm6 = vcmp.eq.s32.totalorder %v2090_v3, %v135_v22  ;;  %vm1730_vm11 = vmpackc.low %vm248_vm5, %vm244_vm9  ;;  %vm256_vm5 = vcmp.eq.s32.totalorder %v2093_v4, %v144_v24 }
  0xd3   :  { %1791 = vmatmul.msk.bf16.gmra.mxu3 %vm1790_vm7, %v1879_v8  ;;  %vm249_vm7 = vcmp.eq.s32.totalorder %v2096_v5, %v138_v21  ;;  %vm1698_vm8 = vmpackc.low %vm247_vm4, %vm243_vm6  ;;  %vm254_vm6 = vcmp.eq.s32.totalorder %v2099_v7, %v141_v23 }
  0xd4   :  { %vm1762_vm13 = vmpackc.low %vm249_vm7, %vm245_vm12  ;;  %vm259_vm12 = vcmp.eq.s32.totalorder %v2090_v3, %v147_v35 }
  0xe0   :  { %1697 = vmatmul.msk.bf16.gmra.mxu0 %vm1696_vm14, %v1879_v8  ;;  %vm246_vm14 = vcmp.eq.s32.totalorder %v2099_v7, %v135_v22 }
  0xe1   :  { %1729 = vmatmul.msk.bf16.gmra.mxu1 %vm1728_vm1, %v1879_v8  ;;  %vm1794_vm15 = vmpackc.low %vm250_vm10, %vm246_vm14  ;;  %vm252_vm1 = vcmp.eq.s32.totalorder %v2093_v4, %v141_v23  ;;  %vm258_vm10 = vcmp.eq.s32.totalorder %v2099_v7, %v144_v24  ;;  %vm260_vm14 = vcmp.eq.s32.totalorder %v2093_v4, %v147_v35 }
  0xe2   :  { %1761 = vmatmul.msk.bf16.gmra.mxu2 %vm1760_vm2, %v1879_v8  ;;  %vm255_vm2 = vcmp.eq.s32.totalorder %v2090_v3, %v144_v24  ;;  %vm1732_vm7 = vmpackc.low %vm256_vm5, %vm252_vm1  ;;  %vm265_vm1 = vcmp.eq.s32.totalorder %v2096_v5, %v150_v34 }
  0xe3   :  { %1793 = vmatmul.msk.bf16.gmra.mxu3 %vm1792_vm3, %v1879_v8  ;;  %vm253_vm3 = vcmp.eq.s32.totalorder %v2096_v5, %v141_v23  ;;  %vm1700_vm4 = vmpackc.low %vm255_vm2, %vm251_vm0  ;;  %vm261_vm0 = vcmp.eq.s32.totalorder %v2096_v5, %v147_v35  ;;  %v168_v23 = vpop.permute.xlu1 %167 }
  0xf0   :  { %1699 = vmatmul.msk.bf16.gmra.mxu0 %vm1698_vm8, %v1879_v8  ;;  %vm257_vm8 = vcmp.eq.s32.totalorder %v2096_v5, %v144_v24  ;;  %v165_v24 = vpop.permute.xlu0 %164 }
  0xf1   :  { %1731 = vmatmul.msk.bf16.gmra.mxu1 %vm1730_vm11, %v1879_v8  ;;  %vm1764_vm9 = vmpackc.low %vm257_vm8, %vm253_vm3  ;;  %vm262_vm3 = vcmp.eq.s32.totalorder %v2099_v7, %v147_v35  ;;  %vm271_vm8 = vcmp.eq.s32.totalorder %v2090_v3, %v156_v50 }
  0xf2   :  { %1763 = vmatmul.msk.bf16.gmra.mxu2 %vm1762_vm13, %v1879_v8  ;;  %vm1796_vm11 = vmpackc.low %vm258_vm10, %vm254_vm6  ;;  %vm263_vm13 = vcmp.eq.s32.totalorder %v2090_v3, %v150_v34  ;;  %vm267_vm10 = vcmp.eq.s32.totalorder %v2090_v3, %v153_v51 }
  0xf3   :  { %1795 = vmatmul.msk.bf16.gmra.mxu3 %vm1794_vm15, %v1879_v8  ;;  %vm264_vm15 = vcmp.eq.s32.totalorder %v2093_v4, %v150_v34  ;;  %vm1702_vm2 = vmpackc.low %vm263_vm13, %vm259_vm12  ;;  %vm268_vm13 = vcmp.eq.s32.totalorder %v2093_v4, %v153_v51 }
  0xf4   :  { %vm1734_vm5 = vmpackc.low %vm264_vm15, %vm260_vm14  ;;  %vm274_vm14 = vcmp.eq.s32.totalorder %v2099_v7, %v156_v50 }
  0xf5   :  { %vm1766_vm6 = vmpackc.low %vm265_vm1, %vm261_vm0  ;;  %vm269_vm0 = vcmp.eq.s32.totalorder %v2096_v5, %v153_v51 }
  0xf6   :  { %vm1704_vm12 = vmpackc.low %vm271_vm8, %vm267_vm10  ;;  %vm278_vm10 = vcmp.eq.s32.totalorder %v2099_v7, %v159_v2 }
  0xfd   :  { %v932_v25 = vpop.f32.mrf.mxu0 }
  0xfe   :  { %v1021_v26 = vpop.f32.mrf.mxu1 }
  0xff   :  { %v1022_v27 = vadd.f32 %v1021_v26, %v932_v25 }
 0x100   :  { %1701 = vmatmul.msk.bf16.gmra.mxu0 %vm1700_vm4, %v1879_v8  ;;  %vm266_vm4 = vcmp.eq.s32.totalorder %v2099_v7, %v150_v34 }
 0x101   :  { %1733 = vmatmul.msk.bf16.gmra.mxu1 %vm1732_vm7, %v1879_v8  ;;  %vm1798_vm7 = vmpackc.low %vm266_vm4, %vm262_vm3  ;;  %vm275_vm4 = vcmp.eq.s32.totalorder %v2090_v3, %v159_v2 }
 0x102   :  { %1765 = vmatmul.msk.bf16.gmra.mxu2 %vm1764_vm9, %v1879_v8  ;;  %vm272_vm9 = vcmp.eq.s32.totalorder %v2093_v4, %v156_v50 }
 0x103   :  { %1797 = vmatmul.msk.bf16.gmra.mxu3 %vm1796_vm11, %v1879_v8  ;;  %vm273_vm11 = vcmp.eq.s32.totalorder %v2096_v5, %v156_v50  ;;  %vm1736_vm15 = vmpackc.low %vm272_vm9, %vm268_vm13  ;;  %vm280_vm9 = vcmp.eq.s32.totalorder %v2093_v4, %v162_v6 }
 0x104   :  { %vm1768_vm1 = vmpackc.low %vm273_vm11, %vm269_vm0  ;;  %vm283_vm0 = vcmp.eq.s32.totalorder %v2090_v3, %v165_v24 }
 0x105   :  { %v1110_v28 = vpop.f32.mrf.mxu2  ;;  %v934_v29 = vpop.f32.mrf.mxu0 }
 0x106   :  { %v1111_v30 = vadd.f32 %v1110_v28, %v1022_v27  ;;  %v1199_v31 = vpop.f32.mrf.mxu3  ;;  %v1023_v32 = vpop.f32.mrf.mxu1 }
 0x107   :  { %v1024_v36 = vadd.f32 %v1023_v32, %v934_v29 }
 0x108   :  { %v1200_v33 = vadd.f32 %v1199_v31, %v1111_v30 }
 0x10a   :  { %1378 = vst [vmem:[#allocation3] sm:$0xff] %v1200_v33 }
 0x10d   :  { %v1112_v37 = vpop.f32.mrf.mxu2  ;;  %v937_v38 = vpop.f32.mrf.mxu0 }
 0x10e   :  { %v1113_v39 = vadd.f32 %v1112_v37, %v1024_v36  ;;  %v1201_v40 = vpop.f32.mrf.mxu3  ;;  %v1026_v41 = vpop.f32.mrf.mxu1 }
 0x10f   :  { %v1027_v43 = vadd.f32 %v1026_v41, %v937_v38 }
 0x110   :  { %v1202_v42 = vadd.f32 %v1201_v40, %v1113_v39  ;;  %1703 = vmatmul.msk.bf16.gmra.mxu0 %vm1702_vm2, %v1879_v8  ;;  %vm270_vm2 = vcmp.eq.s32.totalorder %v2099_v7, %v153_v51  ;;  %v174_v39 = vpop.permute.xlu0 %173  ;;  %v171_v40 = vpop.permute.xlu2 %170 }
 0x111   :  { %1735 = vmatmul.msk.bf16.gmra.mxu1 %vm1734_vm5, %v1879_v8  ;;  %vm1800_vm3 = vmpackc.low %vm274_vm14, %vm270_vm2  ;;  %vm276_vm5 = vcmp.eq.s32.totalorder %v2093_v4, %v159_v2  ;;  %vm282_vm14 = vcmp.eq.s32.totalorder %v2099_v7, %v162_v6  ;;  %vm284_vm2 = vcmp.eq.s32.totalorder %v2093_v4, %v165_v24 }
 0x112   :  { %1379 = vst [vmem:[#allocation3 + $0x8] sm:$0xff] %v1202_v42  ;;  %1767 = vmatmul.msk.bf16.gmra.mxu2 %vm1766_vm6, %v1879_v8  ;;  %vm279_vm6 = vcmp.eq.s32.totalorder %v2090_v3, %v162_v6  ;;  %vm1738_vm11 = vmpackc.low %vm280_vm9, %vm276_vm5  ;;  %vm289_vm5 = vcmp.eq.s32.totalorder %v2096_v5, %v168_v23 }
 0x113   :  { %1799 = vmatmul.msk.bf16.gmra.mxu3 %vm1798_vm7, %v1879_v8  ;;  %vm277_vm7 = vcmp.eq.s32.totalorder %v2096_v5, %v159_v2  ;;  %vm1706_vm8 = vmpackc.low %vm279_vm6, %vm275_vm4  ;;  %vm285_vm4 = vcmp.eq.s32.totalorder %v2096_v5, %v165_v24 }
 0x115   :  { %v1115_v44 = vpop.f32.mrf.mxu2  ;;  %v939_v45 = vpop.f32.mrf.mxu0 }
 0x116   :  { %v1116_v46 = vadd.f32 %v1115_v44, %v1027_v43  ;;  %v1204_v47 = vpop.f32.mrf.mxu3  ;;  %v1028_v48 = vpop.f32.mrf.mxu1 }
 0x117   :  { %v1029_v52 = vadd.f32 %v1028_v48, %v939_v45 }
 0x118   :  { %v1205_v49 = vadd.f32 %v1204_v47, %v1116_v46 }
 0x11a   :  { %1380 = vst [vmem:[#allocation3 + $0x10] sm:$0xff] %v1205_v49 }
 0x11d   :  { %v1117_v53 = vpop.f32.mrf.mxu2  ;;  %v942_v54 = vpop.f32.mrf.mxu0 }
 0x11e   :  { %v1118_v55 = vadd.f32 %v1117_v53, %v1029_v52  ;;  %v1206_v56 = vpop.f32.mrf.mxu3  ;;  %v1031_v57 = vpop.f32.mrf.mxu1 }
 0x11f   :  { %v1032_v59 = vadd.f32 %v1031_v57, %v942_v54 }
 0x120   :  { %v1207_v58 = vadd.f32 %v1206_v56, %v1118_v55  ;;  %1705 = vmatmul.msk.bf16.gmra.mxu0 %vm1704_vm12, %v1879_v8  ;;  %vm281_vm12 = vcmp.eq.s32.totalorder %v2096_v5, %v162_v6  ;;  %v177_v55 = vpop.permute.xlu1 %176  ;;  %v180_v56 = vpop.permute.xlu2 %179 }
 0x121   :  { %1737 = vmatmul.msk.bf16.gmra.mxu1 %vm1736_vm15, %v1879_v8  ;;  %vm1770_vm13 = vmpackc.low %vm281_vm12, %vm277_vm7  ;;  %vm286_vm7 = vcmp.eq.s32.totalorder %v2099_v7, %v165_v24  ;;  %vm295_vm12 = vcmp.eq.s32.totalorder %v2090_v3, %v174_v39 }
 0x122   :  { %1381 = vst [vmem:[#allocation3 + $0x18] sm:$0xff] %v1207_v58  ;;  %1769 = vmatmul.msk.bf16.gmra.mxu2 %vm1768_vm1, %v1879_v8  ;;  %vm1802_vm15 = vmpackc.low %vm282_vm14, %vm278_vm10  ;;  %vm287_vm1 = vcmp.eq.s32.totalorder %v2090_v3, %v168_v23  ;;  %vm291_vm14 = vcmp.eq.s32.totalorder %v2090_v3, %v171_v40 }
 0x123   :  { %1801 = vmatmul.msk.bf16.gmra.mxu3 %vm1800_vm3, %v1879_v8  ;;  %vm288_vm3 = vcmp.eq.s32.totalorder %v2093_v4, %v168_v23  ;;  %vm1708_vm6 = vmpackc.low %vm287_vm1, %vm283_vm0  ;;  %vm292_vm1 = vcmp.eq.s32.totalorder %v2093_v4, %v171_v40 }
 0x124   :  { %vm1740_vm9 = vmpackc.low %vm288_vm3, %vm284_vm2  ;;  %vm298_vm2 = vcmp.eq.s32.totalorder %v2099_v7, %v174_v39 }
 0x125   :  { %v1120_v60 = vpop.f32.mrf.mxu2  ;;  %v944_v61 = vpop.f32.mrf.mxu0  ;;  %vm1772_vm10 = vmpackc.low %vm289_vm5, %vm285_vm4  ;;  %vm293_vm4 = vcmp.eq.s32.totalorder %v2096_v5, %v171_v40 }
 0x126   :  { %v1121_v62 = vadd.f32 %v1120_v60, %v1032_v59  ;;  %v1209_v63 = vpop.f32.mrf.mxu3  ;;  %v1033_v0 = vpop.f32.mrf.mxu1  ;;  %vm1710_vm0 = vmpackc.low %vm295_vm12, %vm291_vm14  ;;  %vm304_vm12 = vcmp.eq.s32.totalorder %v2093_v4, %v180_v56  ;;  %vm302_vm14 = vcmp.eq.s32.totalorder %v2099_v7, %v177_v55 }
 0x127   :  { %v1034_v9 = vadd.f32 %v1033_v0, %v944_v61 }
 0x128   :  { %v1210_v1 = vadd.f32 %v1209_v63, %v1121_v62 }
 0x12a   :  { %1382 = vst [vmem:[#allocation3 + $0x20] sm:$0xff] %v1210_v1 }
 0x12d   :  { %v1122_v10 = vpop.f32.mrf.mxu2  ;;  %v947_v11 = vpop.f32.mrf.mxu0 }
 0x12e   :  { %v1123_v12 = vadd.f32 %v1122_v10, %v1034_v9  ;;  %v1211_v13 = vpop.f32.mrf.mxu3  ;;  %v1036_v14 = vpop.f32.mrf.mxu1 }
 0x12f   :  { %v1037_v16 = vadd.f32 %v1036_v14, %v947_v11 }
 0x130   :  { %v1212_v15 = vadd.f32 %v1211_v13, %v1123_v12  ;;  %1707 = vmatmul.msk.bf16.gmra.mxu0 %vm1706_vm8, %v1879_v8  ;;  %vm290_vm8 = vcmp.eq.s32.totalorder %v2099_v7, %v168_v23  ;;  %v186_v12 = vpop.permute.xlu1 %185  ;;  %v183_v13 = vpop.permute.xlu0 %182 }
 0x131   :  { %1739 = vmatmul.msk.bf16.gmra.mxu1 %vm1738_vm11, %v1879_v8  ;;  %vm1804_vm11 = vmpackc.low %vm290_vm8, %vm286_vm7  ;;  %vm299_vm8 = vcmp.eq.s32.totalorder %v2090_v3, %v177_v55 }
 0x132   :  { %1383 = vst [vmem:[#allocation3 + $0x28] sm:$0xff] %v1212_v15  ;;  %1771 = vmatmul.msk.bf16.gmra.mxu2 %vm1770_vm13, %v1879_v8  ;;  %vm296_vm13 = vcmp.eq.s32.totalorder %v2093_v4, %v174_v39 }
 0x133   :  { %1803 = vmatmul.msk.bf16.gmra.mxu3 %vm1802_vm15, %v1879_v8  ;;  %vm297_vm15 = vcmp.eq.s32.totalorder %v2096_v5, %v174_v39  ;;  %vm1742_vm3 = vmpackc.low %vm296_vm13, %vm292_vm1  ;;  %vm306_vm1 = vcmp.eq.s32.totalorder %v2099_v7, %v180_v56 }
 0x134   :  { %vm1774_vm5 = vmpackc.low %vm297_vm15, %vm293_vm4  ;;  %vm305_vm15 = vcmp.eq.s32.totalorder %v2096_v5, %v180_v56  ;;  %vm311_vm4 = vcmp.eq.s32.totalorder %v2090_v3, %v186_v12 }
 0x135   :  { %v1125_v17 = vpop.f32.mrf.mxu2  ;;  %v949_v18 = vpop.f32.mrf.mxu0 }
 0x136   :  { %v1126_v19 = vadd.f32 %v1125_v17, %v1037_v16  ;;  %v1214_v20 = vpop.f32.mrf.mxu3  ;;  %v1038_v21 = vpop.f32.mrf.mxu1 }
 0x137   :  { %v1039_v25 = vadd.f32 %v1038_v21, %v949_v18 }
 0x138   :  { %v1215_v22 = vadd.f32 %v1214_v20, %v1126_v19 }
 0x13a   :  { %1384 = vst [vmem:[#allocation3 + $0x30] sm:$0xff] %v1215_v22 }
 0x13d   :  { %v1127_v26 = vpop.f32.mrf.mxu2  ;;  %v952_v27 = vpop.f32.mrf.mxu0 }
 0x13e   :  { %v1128_v28 = vadd.f32 %v1127_v26, %v1039_v25  ;;  %v1216_v29 = vpop.f32.mrf.mxu3  ;;  %v1041_v30 = vpop.f32.mrf.mxu1 }
 0x13f   :  { %v1042_v32 = vadd.f32 %v1041_v30, %v952_v27 }
 0x140   :  { %v1217_v31 = vadd.f32 %v1216_v29, %v1128_v28  ;;  %1709 = vmatmul.msk.bf16.gmra.mxu0 %vm1708_vm6, %v1879_v8  ;;  %vm294_vm6 = vcmp.eq.s32.totalorder %v2099_v7, %v171_v40 }
 0x141   :  { %1741 = vmatmul.msk.bf16.gmra.mxu1 %vm1740_vm9, %v1879_v8  ;;  %vm1806_vm7 = vmpackc.low %vm298_vm2, %vm294_vm6  ;;  %vm300_vm9 = vcmp.eq.s32.totalorder %v2093_v4, %v177_v55  ;;  %vm312_vm6 = vcmp.eq.s32.totalorder %v2093_v4, %v186_v12 }
 0x142   :  { %1385 = vst [vmem:[#allocation3 + $0x38] sm:$0xff] %v1217_v31  ;;  %1773 = vmatmul.msk.bf16.gmra.mxu2 %vm1772_vm10, %v1879_v8  ;;  %vm303_vm10 = vcmp.eq.s32.totalorder %v2090_v3, %v180_v56 }
 0x143   :  { %1805 = vmatmul.msk.bf16.gmra.mxu3 %vm1804_vm11, %v1879_v8  ;;  %vm301_vm11 = vcmp.eq.s32.totalorder %v2096_v5, %v177_v55  ;;  %vm1712_vm13 = vmpackc.low %vm303_vm10, %vm299_vm8  ;;  %vm313_vm8 = vcmp.eq.s32.totalorder %v2096_v5, %v186_v12  ;;  %vm314_vm10 = vcmp.eq.s32.totalorder %v2099_v7, %v186_v12 }
 0x144   :  { %vm1776_vm2 = vmpackc.low %vm305_vm15, %vm301_vm11  ;;  %vm310_vm11 = vcmp.eq.s32.totalorder %v2099_v7, %v183_v13 }
 0x145   :  { %v1130_v33 = vpop.f32.mrf.mxu2  ;;  %v954_v34 = vpop.f32.mrf.mxu0  ;;  %vm1810_vm15 = vmpackc.low %vm314_vm10, %vm310_vm11 }
 0x146   :  { %v1131_v35 = vadd.f32 %v1130_v33, %v1042_v32  ;;  %v1219_v36 = vpop.f32.mrf.mxu3  ;;  %v1043_v37 = vpop.f32.mrf.mxu1 }
 0x147   :  { %v1044_v41 = vadd.f32 %v1043_v37, %v954_v34 }
 0x148   :  { %v1220_v38 = vadd.f32 %v1219_v36, %v1131_v35 }
 0x14a   :  { %1386 = vst [vmem:[#allocation3 + $0x40] sm:$0xff] %v1220_v38 }
 0x14d   :  { %v1132_v42 = vpop.f32.mrf.mxu2  ;;  %v957_v43 = vpop.f32.mrf.mxu0 }
 0x14e   :  { %v1133_v44 = vadd.f32 %v1132_v42, %v1044_v41  ;;  %v1221_v45 = vpop.f32.mrf.mxu3  ;;  %v1046_v46 = vpop.f32.mrf.mxu1 }
 0x14f   :  { %v1047_v48 = vadd.f32 %v1046_v46, %v957_v43 }
 0x150   :  { %v1222_v47 = vadd.f32 %v1221_v45, %v1133_v44  ;;  %1711 = vmatmul.msk.bf16.gmra.mxu0 %vm1710_vm0, %v1879_v8  ;;  %vm1744_vm0 = vmpackc.low %vm304_vm12, %vm300_vm9  ;;  %vm309_vm9 = vcmp.eq.s32.totalorder %v2096_v5, %v183_v13 }
 0x151   :  { %1743 = vmatmul.msk.bf16.gmra.mxu1 %vm1742_vm3, %v1879_v8  ;;  %vm1808_vm3 = vmpackc.low %vm306_vm1, %vm302_vm14 }
 0x152   :  { %1387 = vst [vmem:[#allocation3 + $0x48] sm:$0xff] %v1222_v47  ;;  %1775 = vmatmul.msk.bf16.gmra.mxu2 %vm1774_vm5, %v1879_v8  ;;  %vm307_vm5 = vcmp.eq.s32.totalorder %v2090_v3, %v183_v13  ;;  %vm1778_vm14 = vmpackc.low %vm313_vm8, %vm309_vm9 }
 0x153   :  { %1807 = vmatmul.msk.bf16.gmra.mxu3 %vm1806_vm7, %v1879_v8  ;;  %vm308_vm7 = vcmp.eq.s32.totalorder %v2093_v4, %v183_v13  ;;  %vm1714_vm12 = vmpackc.low %vm311_vm4, %vm307_vm5 }
 0x155   :  { %v1135_v49 = vpop.f32.mrf.mxu2  ;;  %v959_v50 = vpop.f32.mrf.mxu0 }
 0x156   :  { %v1136_v51 = vadd.f32 %v1135_v49, %v1047_v48  ;;  %v1224_v52 = vpop.f32.mrf.mxu3  ;;  %v1048_v53 = vpop.f32.mrf.mxu1 }
 0x157   :  { %v1049_v57 = vadd.f32 %v1048_v53, %v959_v50 }
 0x158   :  { %v1225_v54 = vadd.f32 %v1224_v52, %v1136_v51 }
 0x15a   :  { %1388 = vst [vmem:[#allocation3 + $0x50] sm:$0xff] %v1225_v54 }
 0x15d   :  { %v1137_v58 = vpop.f32.mrf.mxu2  ;;  %v962_v59 = vpop.f32.mrf.mxu0 }
 0x15e   :  { %v1138_v60 = vadd.f32 %v1137_v58, %v1049_v57  ;;  %v1226_v61 = vpop.f32.mrf.mxu3  ;;  %v1051_v62 = vpop.f32.mrf.mxu1 }
 0x15f   :  { %v1052_v0 = vadd.f32 %v1051_v62, %v962_v59 }
 0x160   :  { %v1227_v63 = vadd.f32 %v1226_v61, %v1138_v60  ;;  %1713 = vmatmul.msk.bf16.gmra.mxu0 %vm1712_vm13, %v1879_v8  ;;  %vm1746_vm13 = vmpackc.low %vm312_vm6, %vm308_vm7 }
 0x161   :  { %1745 = vmatmul.msk.bf16.gmra.mxu1 %vm1744_vm0, %v1879_v8 }
 0x162   :  { %1389 = vst [vmem:[#allocation3 + $0x58] sm:$0xff] %v1227_v63  ;;  %1777 = vmatmul.msk.bf16.gmra.mxu2 %vm1776_vm2, %v1879_v8 }
 0x163   :  { %1809 = vmatmul.msk.bf16.gmra.mxu3 %vm1808_vm3, %v1879_v8 }
 0x165   :  { %v1140_v1 = vpop.f32.mrf.mxu2  ;;  %v964_v2 = vpop.f32.mrf.mxu0 }
 0x166   :  { %v1141_v6 = vadd.f32 %v1140_v1, %v1052_v0  ;;  %v1229_v9 = vpop.f32.mrf.mxu3  ;;  %v1053_v10 = vpop.f32.mrf.mxu1 }
 0x167   :  { %v1054_v14 = vadd.f32 %v1053_v10, %v964_v2 }
 0x168   :  { %v1230_v11 = vadd.f32 %v1229_v9, %v1141_v6 }
 0x16a   :  { %1390 = vst [vmem:[#allocation3 + $0x60] sm:$0xff] %v1230_v11 }
 0x16d   :  { %v1142_v15 = vpop.f32.mrf.mxu2  ;;  %v967_v16 = vpop.f32.mrf.mxu0 }
 0x16e   :  { %v1143_v17 = vadd.f32 %v1142_v15, %v1054_v14  ;;  %v1231_v18 = vpop.f32.mrf.mxu3  ;;  %v1056_v19 = vpop.f32.mrf.mxu1 }
 0x16f   :  { %v1057_v4 = vadd.f32 %v1056_v19, %v967_v16 }
 0x170   :  { %v1232_v3 = vadd.f32 %v1231_v18, %v1143_v17  ;;  %1715 = vmatmul.msk.bf16.gmra.mxu0 %vm1714_vm12, %v1879_v8 }
 0x171   :  { %1747 = vmatmul.msk.bf16.gmra.mxu1 %vm1746_vm13, %v1879_v8 }
 0x172   :  { %1391 = vst [vmem:[#allocation3 + $0x68] sm:$0xff] %v1232_v3  ;;  %1779 = vmatmul.msk.bf16.gmra.mxu2 %vm1778_vm14, %v1879_v8 }
 0x173   :  { %1811 = vmatmul.msk.bf16.gmra.mxu3 %vm1810_vm15, %v1879_v8 }
 0x175   :  { %v1145_v5 = vpop.f32.mrf.mxu2  ;;  %v969_v20 = vpop.f32.mrf.mxu0 }
 0x176   :  { %v1146_v21 = vadd.f32 %v1145_v5, %v1057_v4  ;;  %v1234_v22 = vpop.f32.mrf.mxu3  ;;  %v1058_v7 = vpop.f32.mrf.mxu1 }
 0x177   :  { %v1059_v24 = vadd.f32 %v1058_v7, %v969_v20 }
 0x178   :  { %v1235_v23 = vadd.f32 %v1234_v22, %v1146_v21 }
 0x17a   :  { %1392 = vst [vmem:[#allocation3 + $0x70] sm:$0xff] %v1235_v23 }
 0x17d   :  { %v1147_v25 = vpop.f32.mrf.mxu2  ;;  %v972_v26 = vpop.f32.mrf.mxu0 }
 0x17e   :  { %v1148_v27 = vadd.f32 %v1147_v25, %v1059_v24  ;;  %v1236_v28 = vpop.f32.mrf.mxu3  ;;  %v1061_v29 = vpop.f32.mrf.mxu1 }
 0x17f   :  { %v1062_v31 = vadd.f32 %v1061_v29, %v972_v26 }
 0x180   :  { %v1237_v30 = vadd.f32 %v1236_v28, %v1148_v27 }
 0x182   :  { %1393 = vst [vmem:[#allocation3 + $0x78] sm:$0xff] %v1237_v30 }
 0x185   :  { %v1150_v32 = vpop.f32.mrf.mxu2  ;;  %v974_v33 = vpop.f32.mrf.mxu0 }
 0x186   :  { %v1151_v8 = vadd.f32 %v1150_v32, %v1062_v31  ;;  %v1239_v34 = vpop.f32.mrf.mxu3  ;;  %v1063_v35 = vpop.f32.mrf.mxu1 }
 0x187   :  { %v1064_v37 = vadd.f32 %v1063_v35, %v974_v33 }
 0x188   :  { %v1240_v36 = vadd.f32 %v1239_v34, %v1151_v8 }
 0x18a   :  { %1394 = vst [vmem:[#allocation3 + $0x80] sm:$0xff] %v1240_v36 }
 0x18d   :  { %v1152_v38 = vpop.f32.mrf.mxu2  ;;  %v977_v39 = vpop.f32.mrf.mxu0 }
 0x18e   :  { %v1153_v40 = vadd.f32 %v1152_v38, %v1064_v37  ;;  %v1241_v41 = vpop.f32.mrf.mxu3  ;;  %v1066_v42 = vpop.f32.mrf.mxu1 }
 0x18f   :  { %v1067_v44 = vadd.f32 %v1066_v42, %v977_v39 }
 0x190   :  { %v1242_v43 = vadd.f32 %v1241_v41, %v1153_v40 }
 0x192   :  { %1395 = vst [vmem:[#allocation3 + $0x88] sm:$0xff] %v1242_v43 }
 0x195   :  { %v1155_v45 = vpop.f32.mrf.mxu2  ;;  %v979_v46 = vpop.f32.mrf.mxu0 }
 0x196   :  { %v1156_v47 = vadd.f32 %v1155_v45, %v1067_v44  ;;  %v1244_v48 = vpop.f32.mrf.mxu3  ;;  %v1068_v49 = vpop.f32.mrf.mxu1 }
 0x197   :  { %v1069_v51 = vadd.f32 %v1068_v49, %v979_v46 }
 0x198   :  { %v1245_v50 = vadd.f32 %v1244_v48, %v1156_v47 }
 0x19a   :  { %1396 = vst [vmem:[#allocation3 + $0x90] sm:$0xff] %v1245_v50 }
 0x19d   :  { %v1157_v52 = vpop.f32.mrf.mxu2  ;;  %v982_v53 = vpop.f32.mrf.mxu0 }
 0x19e   :  { %v1158_v54 = vadd.f32 %v1157_v52, %v1069_v51  ;;  %v1246_v55 = vpop.f32.mrf.mxu3  ;;  %v1071_v56 = vpop.f32.mrf.mxu1 }
 0x19f   :  { %v1072_v58 = vadd.f32 %v1071_v56, %v982_v53 }
 0x1a0   :  { %v1247_v57 = vadd.f32 %v1246_v55, %v1158_v54 }
 0x1a2   :  { %1397 = vst [vmem:[#allocation3 + $0x98] sm:$0xff] %v1247_v57 }
 0x1a5   :  { %v1160_v59 = vpop.f32.mrf.mxu2  ;;  %v984_v60 = vpop.f32.mrf.mxu0 }
 0x1a6   :  { %v1161_v61 = vadd.f32 %v1160_v59, %v1072_v58  ;;  %v1249_v62 = vpop.f32.mrf.mxu3  ;;  %v1073_v63 = vpop.f32.mrf.mxu1 }
 0x1a7   :  { %v1074_v1 = vadd.f32 %v1073_v63, %v984_v60 }
 0x1a8   :  { %v1250_v0 = vadd.f32 %v1249_v62, %v1161_v61 }
 0x1aa   :  { %1398 = vst [vmem:[#allocation3 + $0xa0] sm:$0xff] %v1250_v0 }
 0x1ad   :  { %v1162_v2 = vpop.f32.mrf.mxu2  ;;  %v987_v6 = vpop.f32.mrf.mxu0 }
 0x1ae   :  { %v1163_v9 = vadd.f32 %v1162_v2, %v1074_v1  ;;  %v1251_v10 = vpop.f32.mrf.mxu3  ;;  %v1076_v11 = vpop.f32.mrf.mxu1 }
 0x1af   :  { %v1077_v13 = vadd.f32 %v1076_v11, %v987_v6 }
 0x1b0   :  { %v1252_v12 = vadd.f32 %v1251_v10, %v1163_v9 }
 0x1b2   :  { %1399 = vst [vmem:[#allocation3 + $0xa8] sm:$0xff] %v1252_v12 }
 0x1b5   :  { %v1165_v14 = vpop.f32.mrf.mxu2  ;;  %v989_v15 = vpop.f32.mrf.mxu0 }
 0x1b6   :  { %v1166_v16 = vadd.f32 %v1165_v14, %v1077_v13  ;;  %v1254_v17 = vpop.f32.mrf.mxu3  ;;  %v1078_v18 = vpop.f32.mrf.mxu1 }
 0x1b7   :  { %v1079_v3 = vadd.f32 %v1078_v18, %v989_v15 }
 0x1b8   :  { %v1255_v19 = vadd.f32 %v1254_v17, %v1166_v16 }
 0x1ba   :  { %1400 = vst [vmem:[#allocation3 + $0xb0] sm:$0xff] %v1255_v19 }
 0x1bd   :  { %v1167_v4 = vpop.f32.mrf.mxu2  ;;  %v992_v5 = vpop.f32.mrf.mxu0 }
 0x1be   :  { %v1168_v20 = vadd.f32 %v1167_v4, %v1079_v3  ;;  %v1256_v21 = vpop.f32.mrf.mxu3  ;;  %v1081_v22 = vpop.f32.mrf.mxu1 }
 0x1bf   :  { %v1082_v23 = vadd.f32 %v1081_v22, %v992_v5 }
 0x1c0   :  { %v1257_v7 = vadd.f32 %v1256_v21, %v1168_v20 }
 0x1c2   :  { %1401 = vst [vmem:[#allocation3 + $0xb8] sm:$0xff] %v1257_v7 }
 0x1c5   :  { %v1170_v24 = vpop.f32.mrf.mxu2  ;;  %v994_v25 = vpop.f32.mrf.mxu0 }
 0x1c6   :  { %v1171_v26 = vadd.f32 %v1170_v24, %v1082_v23  ;;  %v1259_v27 = vpop.f32.mrf.mxu3  ;;  %v1083_v28 = vpop.f32.mrf.mxu1 }
 0x1c7   :  { %v1084_v30 = vadd.f32 %v1083_v28, %v994_v25 }
 0x1c8   :  { %v1260_v29 = vadd.f32 %v1259_v27, %v1171_v26 }
 0x1ca   :  { %1402 = vst [vmem:[#allocation3 + $0xc0] sm:$0xff] %v1260_v29 }
 0x1cd   :  { %v1172_v31 = vpop.f32.mrf.mxu2  ;;  %v997_v32 = vpop.f32.mrf.mxu0 }
 0x1ce   :  { %v1173_v33 = vadd.f32 %v1172_v31, %v1084_v30  ;;  %v1261_v8 = vpop.f32.mrf.mxu3  ;;  %v1086_v34 = vpop.f32.mrf.mxu1 }
 0x1cf   :  { %v1087_v36 = vadd.f32 %v1086_v34, %v997_v32 }
 0x1d0   :  { %v1262_v35 = vadd.f32 %v1261_v8, %v1173_v33 }
 0x1d2   :  { %1403 = vst [vmem:[#allocation3 + $0xc8] sm:$0xff] %v1262_v35 }
 0x1d5   :  { %v1175_v37 = vpop.f32.mrf.mxu2  ;;  %v999_v38 = vpop.f32.mrf.mxu0 }
 0x1d6   :  { %v1176_v39 = vadd.f32 %v1175_v37, %v1087_v36  ;;  %v1264_v40 = vpop.f32.mrf.mxu3  ;;  %v1088_v41 = vpop.f32.mrf.mxu1 }
 0x1d7   :  { %v1089_v43 = vadd.f32 %v1088_v41, %v999_v38 }
 0x1d8   :  { %v1265_v42 = vadd.f32 %v1264_v40, %v1176_v39 }
 0x1da   :  { %1404 = vst [vmem:[#allocation3 + $0xd0] sm:$0xff] %v1265_v42 }
 0x1dd   :  { %v1177_v44 = vpop.f32.mrf.mxu2  ;;  %v1002_v45 = vpop.f32.mrf.mxu0 }
 0x1de   :  { %v1178_v46 = vadd.f32 %v1177_v44, %v1089_v43  ;;  %v1266_v47 = vpop.f32.mrf.mxu3  ;;  %v1091_v48 = vpop.f32.mrf.mxu1 }
 0x1df   :  { %v1092_v50 = vadd.f32 %v1091_v48, %v1002_v45 }
 0x1e0   :  { %v1267_v49 = vadd.f32 %v1266_v47, %v1178_v46 }
 0x1e2   :  { %1405 = vst [vmem:[#allocation3 + $0xd8] sm:$0xff] %v1267_v49 }
 0x1e5   :  { %v1180_v51 = vpop.f32.mrf.mxu2  ;;  %v1004_v52 = vpop.f32.mrf.mxu0 }
 0x1e6   :  { %v1181_v53 = vadd.f32 %v1180_v51, %v1092_v50  ;;  %v1269_v54 = vpop.f32.mrf.mxu3  ;;  %v1093_v55 = vpop.f32.mrf.mxu1 }
 0x1e7   :  { %v1094_v57 = vadd.f32 %v1093_v55, %v1004_v52 }
 0x1e8   :  { %v1270_v56 = vadd.f32 %v1269_v54, %v1181_v53 }
 0x1ea   :  { %1406 = vst [vmem:[#allocation3 + $0xe0] sm:$0xff] %v1270_v56 }
 0x1ed   :  { %v1182_v58 = vpop.f32.mrf.mxu2  ;;  %v1007_v61 = vpop.f32.mrf.mxu0 }
 0x1ee   :  { %v1183_v59 = vadd.f32 %v1182_v58, %v1094_v57  ;;  %v1271_v60 = vpop.f32.mrf.mxu3  ;;  %v1096_v62 = vpop.f32.mrf.mxu1 }
 0x1ef   :  { %v1097_v0 = vadd.f32 %v1096_v62, %v1007_v61 }
 0x1f0   :  { %v1272_v63 = vadd.f32 %v1271_v60, %v1183_v59 }
 0x1f2   :  { %1407 = vst [vmem:[#allocation3 + $0xe8] sm:$0xff] %v1272_v63 }
 0x1f5   :  { %v1185_v1 = vpop.f32.mrf.mxu2  ;;  %v1009_v10 = vpop.f32.mrf.mxu0 }
 0x1f6   :  { %v1186_v2 = vadd.f32 %v1185_v1, %v1097_v0  ;;  %v1274_v6 = vpop.f32.mrf.mxu3  ;;  %v1098_v11 = vpop.f32.mrf.mxu1 }
 0x1f7   :  { %v1099_v12 = vadd.f32 %v1098_v11, %v1009_v10 }
 0x1f8   :  { %v1275_v9 = vadd.f32 %v1274_v6, %v1186_v2 }
 0x1fa   :  { %1408 = vst [vmem:[#allocation3 + $0xf0] sm:$0xff] %v1275_v9 }
 0x1fd   :  { %v1187_v13 = vpop.f32.mrf.mxu2 }
 0x1fe   :  { %v1188_v14 = vadd.f32 %v1187_v13, %v1099_v12  ;;  %v1276_v15 = vpop.f32.mrf.mxu3 }
 0x200   :  { %v1277_v16 = vadd.f32 %v1276_v15, %v1188_v14 }
 0x202   :  { %1409 = vst [vmem:[#allocation3 + $0xf8] sm:$0xff] %v1277_v16 }
 0x203   :  { %1422 = dma.vmem_to_hbm [thread:$0]  %s1415_s24, 4096, %s1417_s27, [#allocation4], %s1881_s28, %s1881_s28, %s1882_s29  }
 0x204   :  { %1876 = dma.done.wait [#allocation4], 4096  }
 0x205   :  { %1877 = vsyncadd [#allocation4], 4294963200 }
 0x206   :  { %1427 = vsyncpa [#allocation4], 1 }

</bundles_post_ra>
